<compile_context>
chip_gen: v7x
topology: tpu7x:2x2x1
jax: 0.10.0
libtpu: 0.0.40
codegen_flags: <defaults>
</compile_context>

<pallas_src>
import functools

import jax
import jax.numpy as jnp
from jax.experimental import pallas as pl
from jax.experimental.pallas import tpu as pltpu


def _round_up(a: int, b: int) -> int:
    return ((a + b - 1) // b) * b


def _node_selector_kernel(x_ref, o_ref, acc_ref, *, d_total, tile_d, need_mask):
    # x_ref:   (tile_rows, tile_d) input tile
    # o_ref:   (1, tile_rows) lane-dense output slab (same block across k)
    # acc_ref: (1, tile_rows) f32 accumulator scratch
    k = pl.program_id(1)

    @pl.when(k == 0)
    def _():
        acc_ref[...] = jnp.zeros_like(acc_ref)

    x = x_ref[...]
    if need_mask:
        # Zero out boundary-padded feature columns of the last D-block.
        col = k * tile_d + jax.lax.broadcasted_iota(jnp.int32, x.shape, dimension=1)
        x = jnp.where(col < d_total, x, jnp.zeros_like(x))

    # f32 accumulation without materializing a full f32 copy of the tile.
    partial = jnp.sum(x, axis=-1, dtype=jnp.float32)     # XLU cross-lane reduce
    acc_ref[...] += partial[None, :]

    @pl.when(k == pl.num_programs(1) - 1)
    def _():
        o_ref[...] = (acc_ref[...] / jnp.float32(d_total)).astype(o_ref.dtype)


def node_selector(x, *, target_tile_bytes=4 << 20, max_tile_rows=16384, tile_d=None):
    """Pallas implementation of NodeSelector.forward: x.mean(-1).squeeze(-1)."""
    D = int(x.shape[-1])
    lead_shape = x.shape[:-1]
    R = 1
    for s in lead_shape:
        R *= int(s)

    x2 = x.reshape(R, D)
    itemsize = int(jnp.dtype(x.dtype).itemsize)
    row_bytes = D * itemsize

    # ---- choose the D tile ------------------------------------------------
    if tile_d is not None:
        td = int(tile_d)
        tile_d = D if td >= D else max(128, (td // 128) * 128)
    elif 128 * row_bytes <= target_tile_bytes:
        tile_d = D                               # common case: no D tiling
    else:
        # Even the minimum (128-row) block is over budget at full D: tile D.
        tile_d = max(128, (target_tile_bytes // (128 * itemsize)) // 128 * 128)
        tile_d = min(tile_d, _round_up(D, 128))
        if tile_d >= D:
            tile_d = D

    num_d_tiles = int(pl.cdiv(D, tile_d))
    need_mask = (D % tile_d) != 0

    # ---- choose the row tile (byte-capped, multiple of 128) ---------------
    tile_bytes_per_row = tile_d * itemsize
    tile_rows = (target_tile_bytes // max(1, tile_bytes_per_row)) // 128 * 128
    tile_rows = max(128, min(tile_rows, max_tile_rows))
    tile_rows = min(tile_rows, _round_up(R, 128))   # small-R clamp, keeps 128-mult

    num_row_tiles = int(pl.cdiv(R, tile_rows))
    R_pad = num_row_tiles * tile_rows

    # ---- VMEM budget from actual buffer math -------------------------------
    in_block_bytes = tile_rows * tile_d * itemsize
    out_block_bytes = tile_rows * itemsize
    acc_bytes = tile_rows * 4
    needed = 2 * in_block_bytes + 2 * out_block_bytes + acc_bytes + (1 << 20)
    vmem_limit = min(max(_round_up(needed, 1 << 20), 32 << 20), 48 << 20)

    cost = pl.CostEstimate(
        flops=R * D,
        transcendentals=0,
        bytes_accessed=R * D * itemsize + R_pad * itemsize,
    )

    kernel = functools.partial(
        _node_selector_kernel, d_total=D, tile_d=tile_d, need_mask=need_mask
    )

    out2 = pl.pallas_call(
        kernel,
        out_shape=jax.ShapeDtypeStruct((1, R_pad), x.dtype),
        grid_spec=pltpu.PrefetchScalarGridSpec(
            num_scalar_prefetch=0,
            grid=(num_row_tiles, num_d_tiles),
            in_specs=[pl.BlockSpec((tile_rows, tile_d), lambda i, k: (i, k))],
            out_specs=pl.BlockSpec((1, tile_rows), lambda i, k: (0, i)),
            scratch_shapes=[pltpu.VMEM((1, tile_rows), jnp.float32)],
        ),
        compiler_params=pltpu.CompilerParams(
            dimension_semantics=("parallel", "arbitrary"),
            vmem_limit_bytes=vmem_limit,
        ),
        cost_estimate=cost,
    )(x2)

    scores = out2[0, :R].reshape(lead_shape)
    # torch's .squeeze(-1): only squeezes if the (new) last dim has size 1.
    if scores.ndim >= 1 and scores.shape[-1] == 1:
        scores = jnp.squeeze(scores, axis=-1)
    return scores


if __name__ == "__main__":
    key = jax.random.PRNGKey(0)

    # 1) Primary small case consistent with the module: batch=2, nodes=8, hidden=32.
    x = jax.random.normal(key, (2, 8, 32), dtype=jnp.float32)
    scores = node_selector(x)
    jax.block_until_ready(scores)
    ref = jnp.mean(x, axis=-1)
    assert scores.shape == ref.shape, (scores.shape, ref.shape)
    assert jnp.allclose(scores, ref, atol=1e-5, rtol=1e-5)

    # 2) Multi-row-tile grid path (small target bytes to force several tiles).
    k2 = jax.random.PRNGKey(1)
    x2 = jax.random.normal(k2, (2, 2048, 128), dtype=jnp.float32)
    s2 = node_selector(x2, target_tile_bytes=128 * 1024)
    jax.block_until_ready(s2)
    r2 = jnp.mean(x2, axis=-1)
    assert s2.shape == r2.shape, (s2.shape, r2.shape)
    assert jnp.allclose(s2, r2, atol=1e-5, rtol=1e-5)

    # 3) Non-divisible rows (boundary-padded row block; padded rows discarded).
    k3 = jax.random.PRNGKey(2)
    x3 = jax.random.normal(k3, (3, 100, 64), dtype=jnp.float32)
    s3 = node_selector(x3)
    jax.block_until_ready(s3)
    r3 = jnp.mean(x3, axis=-1)
    assert s3.shape == r3.shape, (s3.shape, r3.shape)
    assert jnp.allclose(s3, r3, atol=1e-5, rtol=1e-5)

    # 4) D-tiled accumulation path with boundary-column masking (forced tile_d).
    k4 = jax.random.PRNGKey(3)
    x4 = jax.random.normal(k4, (2, 8, 200), dtype=jnp.float32)
    s4 = node_selector(x4, tile_d=128)
    jax.block_until_ready(s4)
    r4 = jnp.mean(x4, axis=-1)
    assert s4.shape == r4.shape, (s4.shape, r4.shape)
    assert jnp.allclose(s4, r4, atol=1e-5, rtol=1e-5)

    # 5) squeeze(-1) path: mean gives (..., 1) which torch squeezes away.
    k5 = jax.random.PRNGKey(4)
    x5 = jax.random.normal(k5, (2, 1, 32), dtype=jnp.float32)
    s5 = node_selector(x5)
    jax.block_until_ready(s5)
    r5 = jnp.squeeze(jnp.mean(x5, axis=-1), axis=-1)
    assert s5.shape == r5.shape == (2,), (s5.shape, r5.shape)
    assert jnp.allclose(s5, r5, atol=1e-5, rtol=1e-5)

    # 6) bf16 input: f32 accumulation without a full f32 tile temporary.
    k6 = jax.random.PRNGKey(5)
    x6 = jax.random.normal(k6, (2, 256, 128), dtype=jnp.bfloat16)
    s6 = node_selector(x6)
    jax.block_until_ready(s6)
    r6 = jnp.mean(x6.astype(jnp.float32), axis=-1).astype(jnp.bfloat16)
    assert s6.shape == r6.shape, (s6.shape, r6.shape)
    assert jnp.allclose(s6.astype(jnp.float32), r6.astype(jnp.float32),
                        atol=1e-2, rtol=1e-2)

    print("KERNEL_OK")
</pallas_src>

<mosaic_0001>
module attributes {stable_mosaic.version = 11 : i64} {
  func.func @_node_selector_kernel(%arg0: i32, %arg1: i32, %arg2: memref<128x32xf32, #tpu.memory_space<vmem>>, %arg3: memref<1x128xf32, #tpu.memory_space<vmem>>, %arg4: memref<1x128xf32, #tpu.memory_space<vmem>>) attributes {dimension_semantics = [#tpu.dimension_semantics<parallel>, #tpu.dimension_semantics<arbitrary>], iteration_bounds = array<i64: 1, 1>, scalar_prefetch = 0 : i64, scratch_operands = 1 : i64, tpu.core_type = #tpu.core_type<tc>, window_params = [{transform_indices = @transform_0, window_bounds = array<i64: 128, 32>}, {transform_indices = @transform_1, window_bounds = array<i64: 1, 128>}]} {
    %c0_i32 = arith.constant 0 : i32
    %0 = arith.cmpi eq, %arg1, %c0_i32 : i32
    %1 = arith.extui %0 : i1 to i32
    %c0_i32_0 = arith.constant 0 : i32
    %2 = arith.cmpi ne, %1, %c0_i32_0 : i32
    scf.if %2 {
      %cst_8 = arith.constant 0.000000e+00 : f32
      %12 = vector.broadcast %cst_8 : f32 to vector<1x128xf32>
      %c0_9 = arith.constant 0 : index
      %c0_10 = arith.constant 0 : index
      %13 = vector.load %arg4[%c0_9, %c0_10] : memref<1x128xf32, #tpu.memory_space<vmem>>, vector<1x128xf32>
      tpu.vector_store %arg4[%c0_9, %c0_10], %12 {strides = array<i32>} : memref<1x128xf32, #tpu.memory_space<vmem>>, vector<1x128xf32>,
    } else {
    }
    %c0 = arith.constant 0 : index
    %c0_1 = arith.constant 0 : index
    %3 = vector.load %arg2[%c0, %c0_1] : memref<128x32xf32, #tpu.memory_space<vmem>>, vector<128x32xf32>
    %cst = arith.constant dense<0.000000e+00> : vector<128xf32>
    %4 = vector.multi_reduction <add>, %3, %cst [1] : vector<128x32xf32> to vector<128xf32>
    %c0_2 = arith.constant 0 : index
    %c0_3 = arith.constant 0 : index
    %5 = vector.load %arg4[%c0_2, %c0_3] : memref<1x128xf32, #tpu.memory_space<vmem>>, vector<1x128xf32>
    %6 = vector.shape_cast %4 : vector<128xf32> to vector<1x128xf32>
    %7 = arith.addf %5, %6 : vector<1x128xf32>
    %c0_4 = arith.constant 0 : index
    %c0_5 = arith.constant 0 : index
    %8 = vector.load %arg4[%c0_4, %c0_5] : memref<1x128xf32, #tpu.memory_space<vmem>>, vector<1x128xf32>
    tpu.vector_store %arg4[%c0_4, %c0_5], %7 {strides = array<i32>} : memref<1x128xf32, #tpu.memory_space<vmem>>, vector<1x128xf32>,
    %c0_i32_6 = arith.constant 0 : i32
    %9 = arith.cmpi eq, %arg1, %c0_i32_6 : i32
    %10 = arith.extui %9 : i1 to i32
    %c0_i32_7 = arith.constant 0 : i32
    %11 = arith.cmpi ne, %10, %c0_i32_7 : i32
    scf.if %11 {
      %c0_8 = arith.constant 0 : index
      %c0_9 = arith.constant 0 : index
      %12 = vector.load %arg4[%c0_8, %c0_9] : memref<1x128xf32, #tpu.memory_space<vmem>>, vector<1x128xf32>
      %cst_10 = arith.constant 3.200000e+01 : f32
      %13 = vector.broadcast %cst_10 : f32 to vector<1x128xf32>
      %14 = arith.divf %12, %13 : vector<1x128xf32>
      %c0_11 = arith.constant 0 : index
      %c0_12 = arith.constant 0 : index
      %15 = vector.load %arg3[%c0_11, %c0_12] : memref<1x128xf32, #tpu.memory_space<vmem>>, vector<1x128xf32>
      tpu.vector_store %arg3[%c0_11, %c0_12], %14 {strides = array<i32>} : memref<1x128xf32, #tpu.memory_space<vmem>>, vector<1x128xf32>,
    } else {
    }
    return
  }
  func.func @transform_0(%arg0: i32, %arg1: i32) -> (i32, i32) {
    %c0_i32 = arith.constant 0 : i32
    return %arg0, %arg1 : i32, i32
  }
  func.func @transform_1(%arg0: i32, %arg1: i32) -> (i32, i32) {
    %c0_i32 = arith.constant 0 : i32
    %c0_i32_0 = arith.constant 0 : i32
    return %c0_i32, %arg0 : i32, i32
  }
}

</mosaic_0001>

<bundles_post_ra>
// kernel: tpu_custom_call.1
= control target key start
LH: loop header
LB: loop body
LE: loop exit
PB: predicated region body
PF: predicated region fallthrough
CT: control target
= control target key end

     0   :  { %6 = vsyncpa [#allocation4], 0  ;;  %s2039_s0 = inlined_call_operand.hbm [shape: f32[16,32], index: 0, kind: input, shape index: {}]   ;;  %s2040_s1 = inlined_call_operand.hbm [shape: f32[1,128], index: 1, kind: output, shape index: {}]  }
   0x1   :  { %7 = vsyncpa [#allocation5], 0 }
   0x2   :  { %12 = vsyncadd [#allocation4], 1792  ;;  %s1661_s6 = smov [#allocation3]   ;;  %s1613_s10 = scalar_lea.hbm %s2039_s0, 256 }
   0x3   :  { %s13_s7 = sshll.u32 %s1661_s6, 4  ;;  %p1614_p0 = scmp.ne.s32.totalorder %s2039_s0, %s1613_s10  ;;  %s14_s7 = int_to_ptr.vmem [resolvable:$true] %s13_s7 }
   0x4   :  { %p1617_p1 = scmp.lt.u32.totalorder %s1613_s10, %s2039_s0 }
   0x6   :  { %p1619_p2 = pnand %p1617_p1, %p1614_p0 }
   0x8   :  { %1622 = shalt.err (!%p1619_p2)
}
   0x9   :  { %s1623_s15 = scalar_lea.vmem %s14_s7, 256  ;;  %s1627_s16 = scalar_lea.vmem %s14_s7, 2048 }
   0xa   :  { %p1624_p3 = scmp.ne.s32.totalorder %s14_s7, %s1623_s15  ;;  %p1628_p4 = scmp.lt.s32.totalorder %s14_s7, %s14_s7 }
   0xb   :  { %p1629_p5 = scmp.lt.s32.totalorder %s1627_s16, %s1623_s15 }
   0xd   :  { %p1630_p6 = por %p1629_p5, %p1628_p4 }
   0xf   :  { %p1631_p7 = pnand %p1630_p6, %p1624_p3 }
  0x11   :  { %1634 = shalt.err (!%p1631_p7)
}
  0x12   :  { %s1662_s17 = smov 128   ;;  %s1663_s18 = smov 8  }
  0x13   :  { %19 = dma.hbm_to_vmem [thread:$0]  %s2039_s0, 256, %s14_s7, [#allocation4], %s1662_s17, %s1662_s17, %s1663_s18  }
  0x14   :  { %1657 = dma.done.wait [#allocation4], 2048  }
  0x15   :  { %1658 = vsyncadd [#allocation4], 4294965248  ;;  %vm44_vm0 = vcmask 261120   ;;  %v28_v0 = vld [vmem:[#allocation3] sm:$0xff]  ;;  %v30_v1 = vld [vmem:[#allocation3 + $0x10] sm:$0xff]  ;;  %v1664_v30 = vmov 0   ;;  %v110_v33 = vlaneseq }
  0x16   :  { %v29_v2 = vld [vmem:[#allocation3 + $0x8] sm:$0xff]  ;;  %v45_v3 = vsel %vm44_vm0, %v28_v0, 0.0  ;;  %v51_v4 = vsel %vm44_vm0, %v30_v1, 0.0  ;;  %v31_v5 = vld [vmem:[#allocation3 + $0x18] sm:$0xff]  ;;  %v32_v9 = vld [vmem:[#allocation3 + $0x20] sm:$0xff]  ;;  %1611 = vset.pattern.permute.xlu0 %v1664_v30  ;;  %1612 = vset.pattern.permute.xlu1 %v1664_v30  ;;  %vm1465_vm1 = vcmask 130112  }
  0x17   :  { %46 = vadd.xlane.f32.xlu0 %v45_v3  ;;  %52 = vadd.xlane.f32.xlu1 %v51_v4  ;;  %v48_v6 = vsel %vm44_vm0, %v29_v2, 0.0  ;;  %v54_v7 = vsel %vm44_vm0, %v31_v5, 0.0  ;;  %v33_v8 = vld [vmem:[#allocation3 + $0x28] sm:$0xff]  ;;  %v57_v11 = vsel %vm44_vm0, %v32_v9, 0.0  ;;  %v35_v12 = vld [vmem:[#allocation3 + $0x38] sm:$0xff]  ;;  %v34_v13 = vld [vmem:[#allocation3 + $0x30] sm:$0xff] }
  0x18   :  { %v60_v10 = vsel %vm44_vm0, %v33_v8, 0.0  ;;  %v66_v14 = vsel %vm44_vm0, %v35_v12, 0.0  ;;  %v63_v15 = vsel %vm44_vm0, %v34_v13, 0.0  ;;  %v37_v16 = vld [vmem:[#allocation3 + $0x48] sm:$0xff]  ;;  %v36_v17 = vld [vmem:[#allocation3 + $0x40] sm:$0xff]  ;;  %v39_v20 = vld [vmem:[#allocation3 + $0x58] sm:$0xff] }
  0x19   :  { %v72_v18 = vsel %vm44_vm0, %v37_v16, 0.0  ;;  %v69_v19 = vsel %vm44_vm0, %v36_v17, 0.0  ;;  %v38_v21 = vld [vmem:[#allocation3 + $0x50] sm:$0xff]  ;;  %v78_v22 = vsel %vm44_vm0, %v39_v20, 0.0  ;;  %v41_v24 = vld [vmem:[#allocation3 + $0x68] sm:$0xff]  ;;  %v40_v25 = vld [vmem:[#allocation3 + $0x60] sm:$0xff] }
  0x1a   :  { %v75_v23 = vsel %vm44_vm0, %v38_v21, 0.0  ;;  %v84_v26 = vsel %vm44_vm0, %v41_v24, 0.0  ;;  %v81_v27 = vsel %vm44_vm0, %v40_v25, 0.0  ;;  %v43_v28 = vld [vmem:[#allocation3 + $0x78] sm:$0xff]  ;;  %v42_v29 = vld [vmem:[#allocation3 + $0x70] sm:$0xff]  ;;  %v1707_v36 = vshrl.u32 %v110_v33, 7 }
  0x1b   :  { %49 = vadd.xlane.f32.xlu0 %v48_v6  ;;  %55 = vadd.xlane.f32.xlu1 %v54_v7  ;;  %v90_v31 = vsel %vm44_vm0, %v43_v28, 0.0  ;;  %v87_v32 = vsel %vm44_vm0, %v42_v29, 0.0  ;;  %v1665_v34 = vmov 1966171168   ;;  %vm1472_vm2 = vcmask 195712   ;;  %s1667_s0 = smov [#allocation6]  }
  0x1c   :  { %v627_v35 = vunpack.c.l.s4 %v1665_v34  ;;  %v1710_v38 = vsub.s32 0, %v1707_v36  ;;  %v1713_v39 = vsub.s32 1, %v1707_v36  ;;  %v1716_v40 = vsub.s32 2, %v1707_v36  ;;  %s1595_s21 = sshll.u32 %s1667_s0, 4  ;;  %s1596_s21 = int_to_ptr.vmem [resolvable:$true] %s1595_s21 }
  0x1d   :  { %v1719_v41 = vsub.s32 3, %v1707_v36  ;;  %v1722_v42 = vsub.s32 4, %v1707_v36  ;;  %v1725_v43 = vsub.s32 5, %v1707_v36  ;;  %v1728_v44 = vsub.s32 6, %v1707_v36  ;;  %s1635_s22 = scalar_lea.vmem %s1596_s21, 16  ;;  %s1639_s23 = scalar_lea.vmem %s1596_s21, 32 }
  0x1e   :  { %v628_v37 = vunpack.c.0.s8 %v627_v35  ;;  %v1731_v45 = vsub.s32 7, %v1707_v36  ;;  %vm1479_vm3 = vcmask 261312   ;;  %vm1486_vm4 = vcmask 326912   ;;  %p1636_p8 = scmp.ne.s32.totalorder %s1596_s21, %s1635_s22  ;;  %p1640_p9 = scmp.lt.s32.totalorder %s1596_s21, %s1596_s21 }
  0x1f   :  { %61 = vadd.xlane.f32.xlu1 %v60_v10  ;;  %58 = vadd.xlane.f32.xlu0 %v57_v11  ;;  %vm1493_vm5 = vcmask 392512   ;;  %vm1500_vm6 = vcmask 458112   ;;  %vm1507_vm7 = vcmask 523712   ;;  %vm1514_vm8 = vcmask 589312   ;;  %p1641_p10 = scmp.lt.s32.totalorder %s1639_s23, %s1635_s22 }
  0x20   :  { %v1734_v48 = vsub.s32 %v628_v37, %v1707_v36  ;;  %vm1521_vm9 = vcmask 654912   ;;  %vm1528_vm10 = vcmask 720512   ;;  %vm1535_vm11 = vcmask 786112  }
  0x21   :  { %vm1542_vm12 = vcmask 851712   ;;  %vm1549_vm13 = vcmask 917312   ;;  %vm1556_vm14 = vcmask 982912   ;;  %vm1563_vm15 = vcmask 1048512   ;;  %p1642_p11 = por %p1641_p10, %p1640_p9 }
  0x23   :  { %67 = vadd.xlane.f32.xlu1 %v66_v14  ;;  %64 = vadd.xlane.f32.xlu0 %v63_v15  ;;  %p1643_p12 = pnand %p1642_p11, %p1636_p8 }
  0x27   :  { %73 = vadd.xlane.f32.xlu1 %v72_v18  ;;  %70 = vadd.xlane.f32.xlu0 %v69_v19 }
  0x2b   :  { %79 = vadd.xlane.f32.xlu1 %v78_v22  ;;  %76 = vadd.xlane.f32.xlu0 %v75_v23 }
  0x2f   :  { %85 = vadd.xlane.f32.xlu1 %v84_v26  ;;  %82 = vadd.xlane.f32.xlu0 %v81_v27 }
  0x33   :  { %91 = vadd.xlane.f32.xlu1 %v90_v31  ;;  %88 = vadd.xlane.f32.xlu0 %v87_v32 }
  0xa4   :  { %v47_v46 = vpop.xlane.xlu0 %46  ;;  %v53_v47 = vpop.xlane.xlu1 %52 }
  0xa5   :  { %v113_v49 = vrot.slane %v47_v46, %v1710_v38  ;;  %v117_v50 = vrot.slane %v47_v46, %v1713_v39  ;;  %v121_v51 = vrot.slane %v47_v46, %v1716_v40  ;;  %v125_v52 = vrot.slane %v47_v46, %v1719_v41 }
  0xa6   :  { %v129_v53 = vrot.slane %v47_v46, %v1722_v42  ;;  %v133_v54 = vrot.slane %v47_v46, %v1725_v43  ;;  %v137_v55 = vrot.slane %v47_v46, %v1728_v44  ;;  %v141_v56 = vrot.slane %v47_v46, %v1731_v45 }
  0xa7   :  { %v622_v57 = vcombine.low %v113_v49, %v117_v50  ;;  %v623_v58 = vcombine.low %v121_v51, %v125_v52  ;;  %v177_v59 = vrot.slane %v53_v47, %v1710_v38  ;;  %v181_v60 = vrot.slane %v53_v47, %v1713_v39 }
  0xa8   :  { %v50_v61 = vpop.xlane.xlu0 %49  ;;  %v1746_v62 = vpop.xlane.xlu1 %55  ;;  %v624_v63 = vcombine.low %v129_v53, %v133_v54  ;;  %v625_v0 = vcombine.low %v137_v55, %v141_v56  ;;  %v185_v1 = vrot.slane %v53_v47, %v1716_v40  ;;  %v189_v2 = vrot.slane %v53_v47, %v1719_v41 }
  0xa9   :  { %v632_v3 = vrot.slane %v622_v57, %v1734_v48  ;;  %v639_v4 = vrot.slane %v623_v58, %v1734_v48  ;;  %v145_v5 = vrot.slane %v50_v61, %v1710_v38  ;;  %v149_v6 = vrot.slane %v50_v61, %v1713_v39 }
  0xaa   :  { %v646_v7 = vrot.slane %v624_v63, %v1734_v48  ;;  %v653_v8 = vrot.slane %v625_v0, %v1734_v48  ;;  %v153_v9 = vrot.slane %v50_v61, %v1716_v40  ;;  %v157_v10 = vrot.slane %v50_v61, %v1719_v41 }
  0xab   :  { %v654_v11 = vcombine.low %v632_v3, %v639_v4  ;;  %v161_v12 = vrot.slane %v50_v61, %v1722_v42  ;;  %v165_v13 = vrot.slane %v50_v61, %v1725_v43  ;;  %v169_v14 = vrot.slane %v50_v61, %v1728_v44 }
  0xac   :  { %v1761_v15 = vpop.xlane.xlu1 %61  ;;  %v655_v16 = vcombine.low %v646_v7, %v653_v8  ;;  %v173_v17 = vrot.slane %v50_v61, %v1731_v45  ;;  %v671_v18 = vcombine.low %v145_v5, %v149_v6  ;;  %v672_v19 = vcombine.low %v153_v9, %v157_v10 }
  0xad   :  { %v662_v20 = vrot.slane %v654_v11, %v1734_v48  ;;  %v673_v21 = vcombine.low %v161_v12, %v165_v13  ;;  %v193_v22 = vrot.slane %v53_v47, %v1722_v42  ;;  %v197_v23 = vrot.slane %v53_v47, %v1725_v43 }
  0xae   :  { %v669_v24 = vrot.slane %v655_v16, %v1734_v48  ;;  %v674_v25 = vcombine.low %v169_v14, %v173_v17  ;;  %v681_v26 = vrot.slane %v671_v18, %v1734_v48  ;;  %v688_v27 = vrot.slane %v672_v19, %v1734_v48 }
  0xaf   :  { %v695_v28 = vrot.slane %v673_v21, %v1734_v48  ;;  %v201_v29 = vrot.slane %v53_v47, %v1728_v44  ;;  %v205_v30 = vrot.slane %v53_v47, %v1731_v45  ;;  %v720_v31 = vcombine.low %v177_v59, %v181_v60  ;;  %v59_v60 = vpop.xlane.xlu0 %58 }
  0xb0   :  { %v670_v32 = vcombine.low %v662_v20, %v669_v24  ;;  %v702_v34 = vrot.slane %v674_v25, %v1734_v48  ;;  %v703_v35 = vcombine.low %v681_v26, %v688_v27  ;;  %v721_v37 = vcombine.low %v185_v1, %v189_v2  ;;  %v1777_v52 = vpop.xlane.xlu1 %67 }
  0xb1   :  { %v722_v46 = vcombine.low %v193_v22, %v197_v23  ;;  %v723_v49 = vcombine.low %v201_v29, %v205_v30  ;;  %v730_v50 = vrot.slane %v720_v31, %v1734_v48  ;;  %v209_v51 = vrot.slane %v1746_v62, %v1710_v38 }
  0xb2   :  { %1407 = vperm.xlu0 %1611, %v670_v32   ;;  %v704_v53 = vcombine.low %v695_v28, %v702_v34  ;;  %v711_v54 = vrot.slane %v703_v35, %v1734_v48  ;;  %v737_v47 = vrot.slane %v721_v37, %v1734_v48  ;;  %v213_v55 = vrot.slane %v1746_v62, %v1713_v39 }
  0xb3   :  { %v744_v56 = vrot.slane %v722_v46, %v1734_v48  ;;  %v751_v57 = vrot.slane %v723_v49, %v1734_v48  ;;  %v217_v58 = vrot.slane %v1746_v62, %v1716_v40  ;;  %v221_v59 = vrot.slane %v1746_v62, %v1719_v41 }
  0xb4   :  { %v718_v61 = vrot.slane %v704_v53, %v1734_v48  ;;  %v752_v63 = vcombine.low %v730_v50, %v737_v47  ;;  %v225_v0 = vrot.slane %v1746_v62, %v1722_v42  ;;  %v229_v1 = vrot.slane %v1746_v62, %v1725_v43  ;;  %v74_v14 = vpop.xlane.xlu1 %73 }
  0xb5   :  { %v753_v2 = vcombine.low %v744_v56, %v751_v57  ;;  %v233_v3 = vrot.slane %v1746_v62, %v1728_v44  ;;  %v237_v4 = vrot.slane %v1746_v62, %v1731_v45  ;;  %v769_v5 = vcombine.low %v209_v51, %v213_v55 }
  0xb6   :  { %v719_v6 = vcombine.low %v711_v54, %v718_v61  ;;  %v760_v7 = vrot.slane %v752_v63, %v1734_v48  ;;  %v770_v8 = vcombine.low %v217_v58, %v221_v59  ;;  %v771_v9 = vcombine.low %v225_v0, %v229_v1 }
  0xb7   :  { %v767_v10 = vrot.slane %v753_v2, %v1734_v48  ;;  %v772_v11 = vcombine.low %v233_v3, %v237_v4  ;;  %v779_v12 = vrot.slane %v769_v5, %v1734_v48  ;;  %v241_v13 = vrot.slane %v59_v60, %v1710_v38 }
  0xb8   :  { %1410 = vperm.xlu1 %1612, %v719_v6   ;;  %v786_v16 = vrot.slane %v770_v8, %v1734_v48  ;;  %v793_v17 = vrot.slane %v771_v9, %v1734_v48  ;;  %v245_v62 = vrot.slane %v59_v60, %v1713_v39  ;;  %v249_v18 = vrot.slane %v59_v60, %v1716_v40  ;;  %v80_v8 = vpop.xlane.xlu1 %79 }
  0xb9   :  { %v768_v19 = vcombine.low %v760_v7, %v767_v10  ;;  %v800_v20 = vrot.slane %v772_v11, %v1734_v48  ;;  %v253_v21 = vrot.slane %v59_v60, %v1719_v41  ;;  %v257_v22 = vrot.slane %v59_v60, %v1722_v42 }
  0xba   :  { %v801_v23 = vcombine.low %v779_v12, %v786_v16  ;;  %v261_v24 = vrot.slane %v59_v60, %v1725_v43  ;;  %v265_v25 = vrot.slane %v59_v60, %v1728_v44  ;;  %v269_v26 = vrot.slane %v59_v60, %v1731_v45 }
  0xbb   :  { %v802_v27 = vcombine.low %v793_v17, %v800_v20  ;;  %v818_v28 = vcombine.low %v241_v13, %v245_v62  ;;  %v819_v29 = vcombine.low %v249_v18, %v253_v21  ;;  %v401_v30 = vrot.slane %v74_v14, %v1710_v38 }
  0xbc   :  { %1413 = vperm.xlu1 %1612, %v768_v19   ;;  %v809_v31 = vrot.slane %v801_v23, %v1734_v48  ;;  %v820_v32 = vcombine.low %v257_v22, %v261_v24  ;;  %v821_v34 = vcombine.low %v265_v25, %v269_v26  ;;  %v405_v35 = vrot.slane %v74_v14, %v1713_v39 }
  0xbd   :  { %v816_v37 = vrot.slane %v802_v27, %v1734_v48  ;;  %v828_v46 = vrot.slane %v818_v28, %v1734_v48  ;;  %v835_v49 = vrot.slane %v819_v29, %v1734_v48  ;;  %v409_v50 = vrot.slane %v74_v14, %v1716_v40 }
  0xbe   :  { %v842_v51 = vrot.slane %v820_v32, %v1734_v48  ;;  %v849_v53 = vrot.slane %v821_v34, %v1734_v48  ;;  %v413_v54 = vrot.slane %v74_v14, %v1719_v41  ;;  %v417_v47 = vrot.slane %v74_v14, %v1722_v42  ;;  %v65_v32 = vpop.xlane.xlu0 %64 }
  0xbf   :  { %v817_v55 = vcombine.low %v809_v31, %v816_v37  ;;  %v850_v56 = vcombine.low %v828_v46, %v835_v49  ;;  %v421_v57 = vrot.slane %v74_v14, %v1725_v43  ;;  %v425_v58 = vrot.slane %v74_v14, %v1728_v44 }
  0xc0   :  { %v851_v59 = vcombine.low %v842_v51, %v849_v53  ;;  %v429_v60 = vrot.slane %v74_v14, %v1731_v45  ;;  %v1063_v61 = vcombine.low %v401_v30, %v405_v35  ;;  %v1064_v63 = vcombine.low %v409_v50, %v413_v54 }
  0xc1   :  { %1416 = vperm.xlu1 %1612, %v817_v55   ;;  %v858_v0 = vrot.slane %v850_v56, %v1734_v48  ;;  %v1065_v1 = vcombine.low %v417_v47, %v421_v57  ;;  %v273_v2 = vrot.slane %v1761_v15, %v1710_v38  ;;  %v277_v3 = vrot.slane %v1761_v15, %v1713_v39 }
  0xc2   :  { %v865_v4 = vrot.slane %v851_v59, %v1734_v48  ;;  %v1066_v5 = vcombine.low %v425_v58, %v429_v60  ;;  %v1073_v6 = vrot.slane %v1063_v61, %v1734_v48  ;;  %v1080_v7 = vrot.slane %v1064_v63, %v1734_v48 }
  0xc3   :  { %v1087_v9 = vrot.slane %v1065_v1, %v1734_v48  ;;  %v281_v10 = vrot.slane %v1761_v15, %v1716_v40  ;;  %v285_v11 = vrot.slane %v1761_v15, %v1719_v41  ;;  %v289_v12 = vrot.slane %v1761_v15, %v1722_v42 }
  0xc4   :  { %v866_v13 = vcombine.low %v858_v0, %v865_v4  ;;  %v1094_v14 = vrot.slane %v1066_v5, %v1734_v48  ;;  %v1095_v16 = vcombine.low %v1073_v6, %v1080_v7  ;;  %v293_v17 = vrot.slane %v1761_v15, %v1725_v43 }
  0xc5   :  { %v297_v62 = vrot.slane %v1761_v15, %v1728_v44  ;;  %v301_v18 = vrot.slane %v1761_v15, %v1731_v45  ;;  %v867_v19 = vcombine.low %v273_v2, %v277_v3  ;;  %v868_v20 = vcombine.low %v281_v10, %v285_v11  ;;  %v86_v2 = vpop.xlane.xlu1 %85 }
  0xc6   :  { %1419 = vperm.xlu1 %1612, %v866_v13   ;;  %v1096_v21 = vcombine.low %v1087_v9, %v1094_v14  ;;  %v1103_v22 = vrot.slane %v1095_v16, %v1734_v48  ;;  %v869_v23 = vcombine.low %v289_v12, %v293_v17  ;;  %v465_v24 = vrot.slane %v80_v8, %v1710_v38 }
  0xc7   :  { %v870_v25 = vcombine.low %v297_v62, %v301_v18  ;;  %v877_v26 = vrot.slane %v867_v19, %v1734_v48  ;;  %v884_v27 = vrot.slane %v868_v20, %v1734_v48  ;;  %v469_v28 = vrot.slane %v80_v8, %v1713_v39 }
  0xc8   :  { %v1110_v29 = vrot.slane %v1096_v21, %v1734_v48  ;;  %v891_v15 = vrot.slane %v869_v23, %v1734_v48  ;;  %v473_v30 = vrot.slane %v80_v8, %v1716_v40  ;;  %v477_v31 = vrot.slane %v80_v8, %v1719_v41 }
  0xc9   :  { %v898_v34 = vrot.slane %v870_v25, %v1734_v48  ;;  %v899_v35 = vcombine.low %v877_v26, %v884_v27  ;;  %v481_v37 = vrot.slane %v80_v8, %v1722_v42  ;;  %v485_v46 = vrot.slane %v80_v8, %v1725_v43 }
  0xca   :  { %v1111_v49 = vcombine.low %v1103_v22, %v1110_v29  ;;  %v489_v50 = vrot.slane %v80_v8, %v1728_v44  ;;  %v493_v51 = vrot.slane %v80_v8, %v1731_v45  ;;  %v1161_v53 = vcombine.low %v465_v24, %v469_v28 }
  0xcb   :  { %v900_v54 = vcombine.low %v891_v15, %v898_v34  ;;  %v907_v47 = vrot.slane %v899_v35, %v1734_v48  ;;  %v1162_v55 = vcombine.low %v473_v30, %v477_v31  ;;  %v1163_v56 = vcombine.low %v481_v37, %v485_v46 }
  0xcc   :  { %1434 = vperm.xlu0 %1611, %v1111_v49   ;;  %v1164_v57 = vcombine.low %v489_v50, %v493_v51  ;;  %v1171_v58 = vrot.slane %v1161_v53, %v1734_v48  ;;  %v305_v59 = vrot.slane %v65_v32, %v1710_v38  ;;  %v309_v60 = vrot.slane %v65_v32, %v1713_v39 }
  0xcd   :  { %v914_v61 = vrot.slane %v900_v54, %v1734_v48  ;;  %v1178_v63 = vrot.slane %v1162_v55, %v1734_v48  ;;  %v1185_v0 = vrot.slane %v1163_v56, %v1734_v48  ;;  %v313_v1 = vrot.slane %v65_v32, %v1716_v40 }
  0xce   :  { %v1192_v3 = vrot.slane %v1164_v57, %v1734_v48  ;;  %v317_v4 = vrot.slane %v65_v32, %v1719_v41  ;;  %v321_v5 = vrot.slane %v65_v32, %v1722_v42  ;;  %v325_v6 = vrot.slane %v65_v32, %v1725_v43 }
  0xcf   :  { %v915_v7 = vcombine.low %v907_v47, %v914_v61  ;;  %v1193_v8 = vcombine.low %v1171_v58, %v1178_v63  ;;  %v329_v9 = vrot.slane %v65_v32, %v1728_v44  ;;  %v333_v10 = vrot.slane %v65_v32, %v1731_v45  ;;  %v92_v47 = vpop.xlane.xlu1 %91 }
  0xd0   :  { %v1194_v11 = vcombine.low %v1185_v0, %v1192_v3  ;;  %v916_v12 = vcombine.low %v305_v59, %v309_v60  ;;  %v917_v13 = vcombine.low %v313_v1, %v317_v4  ;;  %v918_v14 = vcombine.low %v321_v5, %v325_v6  ;;  %v71_v4 = vpop.xlane.xlu0 %70 }
  0xd1   :  { %1422 = vperm.xlu1 %1612, %v915_v7   ;;  %v1201_v16 = vrot.slane %v1193_v8, %v1734_v48  ;;  %v919_v17 = vcombine.low %v329_v9, %v333_v10  ;;  %v529_v62 = vrot.slane %v86_v2, %v1710_v38  ;;  %v533_v18 = vrot.slane %v86_v2, %v1713_v39 }
  0xd2   :  { %v1208_v19 = vrot.slane %v1194_v11, %v1734_v48  ;;  %v926_v20 = vrot.slane %v916_v12, %v1734_v48  ;;  %v933_v21 = vrot.slane %v917_v13, %v1734_v48  ;;  %v940_v22 = vrot.slane %v918_v14, %v1734_v48 }
  0xd3   :  { %v947_v23 = vrot.slane %v919_v17, %v1734_v48  ;;  %v537_v24 = vrot.slane %v86_v2, %v1716_v40  ;;  %v541_v25 = vrot.slane %v86_v2, %v1719_v41  ;;  %v545_v26 = vrot.slane %v86_v2, %v1722_v42 }
  0xd4   :  { %v1209_v27 = vcombine.low %v1201_v16, %v1208_v19  ;;  %v948_v28 = vcombine.low %v926_v20, %v933_v21  ;;  %v549_v29 = vrot.slane %v86_v2, %v1725_v43  ;;  %v553_v15 = vrot.slane %v86_v2, %v1728_v44 }
  0xd5   :  { %v949_v30 = vcombine.low %v940_v22, %v947_v23  ;;  %v557_v31 = vrot.slane %v86_v2, %v1731_v45  ;;  %v1259_v32 = vcombine.low %v529_v62, %v533_v18  ;;  %v1260_v34 = vcombine.low %v537_v24, %v541_v25 }
  0xd6   :  { %1440 = vperm.xlu0 %1611, %v1209_v27   ;;  %v956_v35 = vrot.slane %v948_v28, %v1734_v48  ;;  %v1261_v37 = vcombine.low %v545_v26, %v549_v29  ;;  %v337_v46 = vrot.slane %v1777_v52, %v1710_v38  ;;  %v341_v49 = vrot.slane %v1777_v52, %v1713_v39  ;;  %v77_v28 = vpop.xlane.xlu0 %76 }
  0xd7   :  { %v963_v50 = vrot.slane %v949_v30, %v1734_v48  ;;  %v1262_v51 = vcombine.low %v553_v15, %v557_v31  ;;  %v1269_v53 = vrot.slane %v1259_v32, %v1734_v48  ;;  %v1276_v54 = vrot.slane %v1260_v34, %v1734_v48 }
  0xd8   :  { %v1283_v55 = vrot.slane %v1261_v37, %v1734_v48  ;;  %v345_v56 = vrot.slane %v1777_v52, %v1716_v40  ;;  %v349_v57 = vrot.slane %v1777_v52, %v1719_v41  ;;  %v353_v58 = vrot.slane %v1777_v52, %v1722_v42 }
  0xd9   :  { %v964_v59 = vcombine.low %v956_v35, %v963_v50  ;;  %v1290_v60 = vrot.slane %v1262_v51, %v1734_v48  ;;  %v1291_v61 = vcombine.low %v1269_v53, %v1276_v54  ;;  %v357_v63 = vrot.slane %v1777_v52, %v1725_v43 }
  0xda   :  { %v361_v0 = vrot.slane %v1777_v52, %v1728_v44  ;;  %v365_v1 = vrot.slane %v1777_v52, %v1731_v45  ;;  %v965_v2 = vcombine.low %v337_v46, %v341_v49  ;;  %v966_v3 = vcombine.low %v345_v56, %v349_v57 }
  0xdb   :  { %1425 = vperm.xlu1 %1612, %v964_v59   ;;  %v1292_v5 = vcombine.low %v1283_v55, %v1290_v60  ;;  %v1299_v6 = vrot.slane %v1291_v61, %v1734_v48  ;;  %v967_v7 = vcombine.low %v353_v58, %v357_v63  ;;  %v593_v8 = vrot.slane %v92_v47, %v1710_v38 }
  0xdc   :  { %v968_v9 = vcombine.low %v361_v0, %v365_v1  ;;  %v975_v10 = vrot.slane %v965_v2, %v1734_v48  ;;  %v982_v11 = vrot.slane %v966_v3, %v1734_v48  ;;  %v597_v12 = vrot.slane %v92_v47, %v1713_v39  ;;  %v83_v1 = vpop.xlane.xlu0 %82 }
  0xdd   :  { %v1306_v13 = vrot.slane %v1292_v5, %v1734_v48  ;;  %v989_v52 = vrot.slane %v967_v7, %v1734_v48  ;;  %v601_v14 = vrot.slane %v92_v47, %v1716_v40  ;;  %v605_v16 = vrot.slane %v92_v47, %v1719_v41 }
  0xde   :  { %v996_v17 = vrot.slane %v968_v9, %v1734_v48  ;;  %v997_v62 = vcombine.low %v975_v10, %v982_v11  ;;  %v609_v18 = vrot.slane %v92_v47, %v1722_v42  ;;  %v613_v19 = vrot.slane %v92_v47, %v1725_v43 }
  0xdf   :  { %v1307_v20 = vcombine.low %v1299_v6, %v1306_v13  ;;  %v617_v21 = vrot.slane %v92_v47, %v1728_v44  ;;  %v621_v22 = vrot.slane %v92_v47, %v1731_v45  ;;  %v1357_v23 = vcombine.low %v593_v8, %v597_v12 }
  0xe0   :  { %v998_v24 = vcombine.low %v989_v52, %v996_v17  ;;  %v1005_v25 = vrot.slane %v997_v62, %v1734_v48  ;;  %v1358_v26 = vcombine.low %v601_v14, %v605_v16  ;;  %v1359_v27 = vcombine.low %v609_v18, %v613_v19 }
  0xe1   :  { %1446 = vperm.xlu0 %1611, %v1307_v20   ;;  %v1360_v29 = vcombine.low %v617_v21, %v621_v22  ;;  %v1367_v15 = vrot.slane %v1357_v23, %v1734_v48  ;;  %v369_v30 = vrot.slane %v71_v4, %v1710_v38  ;;  %v373_v31 = vrot.slane %v71_v4, %v1713_v39 }
  0xe2   :  { %v1012_v32 = vrot.slane %v998_v24, %v1734_v48  ;;  %v1374_v34 = vrot.slane %v1358_v26, %v1734_v48  ;;  %v1381_v35 = vrot.slane %v1359_v27, %v1734_v48  ;;  %v377_v37 = vrot.slane %v71_v4, %v1716_v40 }
  0xe3   :  { %v1388_v46 = vrot.slane %v1360_v29, %v1734_v48  ;;  %v381_v49 = vrot.slane %v71_v4, %v1719_v41  ;;  %v385_v50 = vrot.slane %v71_v4, %v1722_v42  ;;  %v389_v51 = vrot.slane %v71_v4, %v1725_v43 }
  0xe4   :  { %v1013_v53 = vcombine.low %v1005_v25, %v1012_v32  ;;  %v1389_v54 = vcombine.low %v1367_v15, %v1374_v34  ;;  %v393_v47 = vrot.slane %v71_v4, %v1728_v44  ;;  %v397_v55 = vrot.slane %v71_v4, %v1731_v45  ;;  %v89_v25 = vpop.xlane.xlu0 %88 }
  0xe5   :  { %v1390_v56 = vcombine.low %v1381_v35, %v1388_v46  ;;  %v1014_v57 = vcombine.low %v369_v30, %v373_v31  ;;  %v1015_v58 = vcombine.low %v377_v37, %v381_v49  ;;  %v1016_v59 = vcombine.low %v385_v50, %v389_v51 }
  0xe6   :  { %1428 = vperm.xlu1 %1612, %v1013_v53   ;;  %v1397_v60 = vrot.slane %v1389_v54, %v1734_v48  ;;  %v1017_v61 = vcombine.low %v393_v47, %v397_v55  ;;  %v433_v63 = vrot.slane %v77_v28, %v1710_v38  ;;  %v437_v0 = vrot.slane %v77_v28, %v1713_v39 }
  0xe7   :  { %v1404_v2 = vrot.slane %v1390_v56, %v1734_v48  ;;  %v1024_v3 = vrot.slane %v1014_v57, %v1734_v48  ;;  %v1031_v5 = vrot.slane %v1015_v58, %v1734_v48  ;;  %v1038_v4 = vrot.slane %v1016_v59, %v1734_v48 }
  0xe8   :  { %v1045_v6 = vrot.slane %v1017_v61, %v1734_v48  ;;  %v441_v7 = vrot.slane %v77_v28, %v1716_v40  ;;  %v445_v8 = vrot.slane %v77_v28, %v1719_v41  ;;  %v449_v9 = vrot.slane %v77_v28, %v1722_v42 }
  0xe9   :  { %v1405_v10 = vcombine.low %v1397_v60, %v1404_v2  ;;  %v1046_v11 = vcombine.low %v1024_v3, %v1031_v5  ;;  %v453_v12 = vrot.slane %v77_v28, %v1725_v43  ;;  %v457_v13 = vrot.slane %v77_v28, %v1728_v44 }
  0xea   :  { %v1047_v52 = vcombine.low %v1038_v4, %v1045_v6  ;;  %v461_v14 = vrot.slane %v77_v28, %v1731_v45  ;;  %v1112_v16 = vcombine.low %v433_v63, %v437_v0  ;;  %v1113_v17 = vcombine.low %v441_v7, %v445_v8 }
  0xeb   :  { %1452 = vperm.xlu0 %1611, %v1405_v10   ;;  %v1054_v62 = vrot.slane %v1046_v11, %v1734_v48  ;;  %v1114_v18 = vcombine.low %v449_v9, %v453_v12  ;;  %v497_v19 = vrot.slane %v83_v1, %v1710_v38  ;;  %v501_v20 = vrot.slane %v83_v1, %v1713_v39 }
  0xec   :  { %v1061_v21 = vrot.slane %v1047_v52, %v1734_v48  ;;  %v1115_v22 = vcombine.low %v457_v13, %v461_v14  ;;  %v1122_v23 = vrot.slane %v1112_v16, %v1734_v48  ;;  %v1129_v24 = vrot.slane %v1113_v17, %v1734_v48 }
  0xed   :  { %v1136_v26 = vrot.slane %v1114_v18, %v1734_v48  ;;  %v505_v27 = vrot.slane %v83_v1, %v1716_v40  ;;  %v509_v28 = vrot.slane %v83_v1, %v1719_v41  ;;  %v513_v29 = vrot.slane %v83_v1, %v1722_v42 }
  0xee   :  { %v1062_v15 = vcombine.low %v1054_v62, %v1061_v21  ;;  %v1143_v30 = vrot.slane %v1115_v22, %v1734_v48  ;;  %v1144_v31 = vcombine.low %v1122_v23, %v1129_v24  ;;  %v517_v32 = vrot.slane %v83_v1, %v1725_v43 }
  0xef   :  { %v521_v34 = vrot.slane %v83_v1, %v1728_v44  ;;  %v525_v35 = vrot.slane %v83_v1, %v1731_v45  ;;  %v1210_v37 = vcombine.low %v497_v19, %v501_v20  ;;  %v1211_v46 = vcombine.low %v505_v27, %v509_v28 }
  0xf0   :  { %1431 = vperm.xlu1 %1612, %v1062_v15   ;;  %v1145_v49 = vcombine.low %v1136_v26, %v1143_v30  ;;  %v1152_v50 = vrot.slane %v1144_v31, %v1734_v48  ;;  %v1212_v51 = vcombine.low %v513_v29, %v517_v32  ;;  %v561_v53 = vrot.slane %v89_v25, %v1710_v38 }
  0xf1   :  { %v1213_v54 = vcombine.low %v521_v34, %v525_v35  ;;  %v1220_v47 = vrot.slane %v1210_v37, %v1734_v48  ;;  %v1227_v55 = vrot.slane %v1211_v46, %v1734_v48  ;;  %v565_v56 = vrot.slane %v89_v25, %v1713_v39 }
  0xf2   :  { %v1159_v57 = vrot.slane %v1145_v49, %v1734_v48  ;;  %v1234_v58 = vrot.slane %v1212_v51, %v1734_v48  ;;  %v569_v59 = vrot.slane %v89_v25, %v1716_v40  ;;  %v573_v60 = vrot.slane %v89_v25, %v1719_v41 }
  0xf3   :  { %v1241_v61 = vrot.slane %v1213_v54, %v1734_v48  ;;  %v1242_v63 = vcombine.low %v1220_v47, %v1227_v55  ;;  %v577_v38 = vrot.slane %v89_v25, %v1722_v42  ;;  %v581_v0 = vrot.slane %v89_v25, %v1725_v43 }
  0xf4   :  { %v1160_v1 = vcombine.low %v1152_v50, %v1159_v57  ;;  %v585_v2 = vrot.slane %v89_v25, %v1728_v44  ;;  %v589_v39 = vrot.slane %v89_v25, %v1731_v45  ;;  %v1308_v3 = vcombine.low %v561_v53, %v565_v56 }
  0xf5   :  { %v1243_v5 = vcombine.low %v1234_v58, %v1241_v61  ;;  %v1250_v4 = vrot.slane %v1242_v63, %v1734_v48  ;;  %v1309_v6 = vcombine.low %v569_v59, %v573_v60  ;;  %v1310_v40 = vcombine.low %v577_v38, %v581_v0 }
  0xf6   :  { %1437 = vperm.xlu1 %1612, %v1160_v1   ;;  %v1311_v41 = vcombine.low %v585_v2, %v589_v39  ;;  %v1318_v7 = vrot.slane %v1308_v3, %v1734_v48  ;;  %v1666_v52 = vmov 0.0   ;;  %v1991_v19 = vand.u32 127, %v110_v33 }
  0xf7   :  { %v1257_v8 = vrot.slane %v1243_v5, %v1734_v48  ;;  %v1325_v42 = vrot.slane %v1309_v6, %v1734_v48  ;;  %v1332_v43 = vrot.slane %v1310_v40, %v1734_v48  ;;  %27 = vst [vmem:[#allocation2] sm:$0x1] %v1666_v52 }
  0xf8   :  { %v1339_v44 = vrot.slane %v1311_v41, %v1734_v48  ;;  %v1460_v20 = vadd.s32 4294967288, %v1991_v19  ;;  %v1467_v22 = vadd.s32 4294967280, %v1991_v19  ;;  %v1474_v23 = vadd.s32 4294967272, %v1991_v19 }
  0xf9   :  { %v1258_v9 = vcombine.low %v1250_v4, %v1257_v8  ;;  %v1340_v45 = vcombine.low %v1318_v7, %v1325_v42  ;;  %v1481_v24 = vadd.s32 4294967264, %v1991_v19  ;;  %v1488_v26 = vadd.s32 4294967256, %v1991_v19 }
  0xfa   :  { %v1341_v10 = vcombine.low %v1332_v43, %v1339_v44  ;;  %v1463_v25 = vsub.s32 %v1460_v20, %v1707_v36  ;;  %v1470_v28 = vsub.s32 %v1467_v22, %v1707_v36  ;;  %v1495_v29 = vadd.s32 4294967248, %v1991_v19 }
  0xfb   :  { %1443 = vperm.xlu1 %1612, %v1258_v9   ;;  %v1348_v11 = vrot.slane %v1340_v45, %v1734_v48  ;;  %v1458_v33 = vsub.s32 %v1991_v19, %v1707_v36  ;;  %v1477_v15 = vsub.s32 %v1474_v23, %v1707_v36  ;;  %v1502_v30 = vadd.s32 4294967240, %v1991_v19 }
  0xfc   :  { %v1355_v12 = vrot.slane %v1341_v10, %v1734_v48  ;;  %v1484_v32 = vsub.s32 %v1481_v24, %v1707_v36  ;;  %v1509_v34 = vadd.s32 4294967232, %v1991_v19  ;;  %v1491_v37 = vsub.s32 %v1488_v26, %v1707_v36 }
  0xfd   :  { %v1498_v50 = vsub.s32 %v1495_v29, %v1707_v36  ;;  %v1505_v54 = vsub.s32 %v1502_v30, %v1707_v36  ;;  %v1523_v56 = vadd.s32 4294967216, %v1991_v19  ;;  %v1516_v58 = vadd.s32 4294967224, %v1991_v19 }
  0xfe   :  { %v1356_v13 = vcombine.low %v1348_v11, %v1355_v12  ;;  %v1512_v55 = vsub.s32 %v1509_v34, %v1707_v36  ;;  %v1530_v0 = vadd.s32 4294967208, %v1991_v19  ;;  %v1537_v40 = vadd.s32 4294967200, %v1991_v19  ;;  %v93_v30 = vld [vmem:[#allocation2] sm:$0x1] }
  0xff   :  { %v1526_v5 = vsub.s32 %v1523_v56, %v1707_v36  ;;  %v1519_v4 = vsub.s32 %v1516_v58, %v1707_v36  ;;  %v1544_v42 = vadd.s32 4294967192, %v1991_v19  ;;  %v1551_v12 = vadd.s32 4294967184, %v1991_v19 }
 0x100   :  { %1449 = vperm.xlu1 %1612, %v1356_v13   ;;  %v1533_v45 = vsub.s32 %v1530_v0, %v1707_v36  ;;  %v1540_v10 = vsub.s32 %v1537_v40, %v1707_v36  ;;  %v1558_v13 = vadd.s32 4294967176, %v1991_v19 }
 0x101   :  { %v1554_v20 = vsub.s32 %v1551_v12, %v1707_v36 }
 0x131   :  { %v1408_v27 = vpop.permute.xlu0 %1407 }
 0x132   :  { %v1459_v51 = vrot.slane %v1408_v27, %v1458_v33 }
 0x137   :  { %v1411_v14 = vpop.permute.xlu1 %1410 }
 0x138   :  { %v1464_v35 = vrot.slane %v1411_v14, %v1463_v25 }
 0x13a   :  { %v1466_v57 = vsel %vm1465_vm1, %v1464_v35, %v1459_v51 }
 0x13b   :  { %v1414_v16 = vpop.permute.xlu1 %1413 }
 0x13c   :  { %v1471_v46 = vrot.slane %v1414_v16, %v1470_v28 }
 0x13e   :  { %v1473_v61 = vsel %vm1472_vm2, %v1471_v46, %v1466_v57 }
 0x140   :  { %v1417_v17 = vpop.permute.xlu1 %1416 }
 0x141   :  { %v1478_v53 = vrot.slane %v1417_v17, %v1477_v15 }
 0x143   :  { %v1480_v38 = vsel %vm1479_vm3, %v1478_v53, %v1473_v61 }
 0x145   :  { %v1420_v62 = vpop.permute.xlu1 %1419 }
 0x146   :  { %v1485_v47 = vrot.slane %v1420_v62, %v1484_v32  ;;  %v1547_v62 = vsub.s32 %v1544_v42, %v1707_v36 }
 0x148   :  { %v1487_v2 = vsel %vm1486_vm4, %v1485_v47, %v1480_v38 }
 0x14b   :  { %v1435_v49 = vpop.permute.xlu0 %1434 }
 0x14c   :  { %v1520_v9 = vrot.slane %v1435_v49, %v1519_v4 }
 0x150   :  { %v1423_v18 = vpop.permute.xlu1 %1422 }
 0x151   :  { %v1492_v59 = vrot.slane %v1423_v18, %v1491_v37 }
 0x153   :  { %v1494_v6 = vsel %vm1493_vm5, %v1492_v59, %v1487_v2 }
 0x155   :  { %v1441_v39 = vpop.permute.xlu0 %1440 }
 0x156   :  { %v1534_v17 = vrot.slane %v1441_v39, %v1533_v45 }
 0x15a   :  { %v1426_v21 = vpop.permute.xlu1 %1425 }
 0x15b   :  { %v1499_v63 = vrot.slane %v1426_v21, %v1498_v50  ;;  %v1561_v21 = vsub.s32 %v1558_v13, %v1707_v36 }
 0x15d   :  { %v1501_v41 = vsel %vm1500_vm6, %v1499_v63, %v1494_v6 }
 0x160   :  { %v1447_v11 = vpop.permute.xlu0 %1446 }
 0x161   :  { %v1548_v25 = vrot.slane %v1447_v11, %v1547_v62 }
 0x165   :  { %v1429_v31 = vpop.permute.xlu1 %1428 }
 0x166   :  { %v1506_v1 = vrot.slane %v1429_v31, %v1505_v54 }
 0x168   :  { %v1508_v7 = vsel %vm1507_vm7, %v1506_v1, %v1501_v41 }
 0x16a   :  { %v1453_v23 = vpop.permute.xlu0 %1452 }
 0x16b   :  { %v1562_v27 = vrot.slane %v1453_v23, %v1561_v21 }
 0x16f   :  { %v1432_v60 = vpop.permute.xlu1 %1431 }
 0x170   :  { %v1513_v3 = vrot.slane %v1432_v60, %v1512_v55 }
 0x172   :  { %v1515_v43 = vsel %vm1514_vm8, %v1513_v3, %v1508_v7 }
 0x173   :  { %v1522_v52 = vsel %vm1521_vm9, %v1520_v9, %v1515_v43 }
 0x175   :  { %v1438_v8 = vpop.permute.xlu1 %1437 }
 0x176   :  { %v1527_v44 = vrot.slane %v1438_v8, %v1526_v5 }
 0x178   :  { %v1529_v14 = vsel %vm1528_vm10, %v1527_v44, %v1522_v52 }
 0x179   :  { %v1536_v22 = vsel %vm1535_vm11, %v1534_v17, %v1529_v14 }
 0x17a   :  { %v1444_v16 = vpop.permute.xlu1 %1443 }
 0x17b   :  { %v1541_v18 = vrot.slane %v1444_v16, %v1540_v10 }
 0x17d   :  { %v1543_v24 = vsel %vm1542_vm12, %v1541_v18, %v1536_v22 }
 0x17e   :  { %v1550_v28 = vsel %vm1549_vm13, %v1548_v25, %v1543_v24 }
 0x17f   :  { %v1450_v19 = vpop.permute.xlu1 %1449 }
 0x180   :  { %v1555_v26 = vrot.slane %v1450_v19, %v1554_v20 }
 0x182   :  { %v1557_v29 = vsel %vm1556_vm14, %v1555_v26, %v1550_v28 }
 0x183   :  { %v1564_v33 = vsel %vm1563_vm15, %v1562_v27, %v1557_v29 }
 0x184   :  { %v1571_v15 = vrot.slane %v1564_v33, %v1734_v48 }
 0x186   :  { %v1578_v31 = vrot.slane %v1571_v15, %v1734_v48 }
 0x188   :  { %v1580_v32 = vadd.f32 %v1578_v31, %v93_v30 }
 0x18a   :  { %1581 = vst [vmem:[#allocation2] sm:$0x1] %v1580_v32 }
 0x191   :  { %v1585_v36 = vld [vmem:[#allocation2] sm:$0x1] }
 0x192   :  { %v1587_v34 = vmul.f32 0.03125, %v1585_v36 }
 0x194   :  { %1588 = vst [vmem:[#allocation6] sm:$0x1] %v1587_v34 }
 0x195   :  { %1646 = shalt.err (!%p1643_p12)
}
 0x196   :  { %s1647_s26 = scalar_lea.hbm %s2040_s1, 16 }
 0x197   :  { %p1648_p13 = scmp.ne.s32.totalorder %s2040_s1, %s1647_s26  ;;  %p1651_p0 = scmp.lt.u32.totalorder %s1647_s26, %s2040_s1 }
 0x199   :  { %p1653_p1 = pnand %p1651_p0, %p1648_p13 }
 0x19b   :  { %1656 = shalt.err (!%p1653_p1)
}
 0x19c   :  { %1598 = dma.vmem_to_hbm [thread:$0]  %s1596_s21, 16, %s2040_s1, [#allocation5]  }
 0x19d   :  { %1659 = dma.done.wait [#allocation5], 16  }
 0x19e   :  { %1660 = vsyncadd [#allocation5], 4294967280 }
 0x19f   :  { %1602 = vsyncpa [#allocation4], 1 }
 0x1a0   :  { %1603 = vsyncpa [#allocation5], 1 }

</bundles_post_ra>
